<compile_context>
chip_gen: v7x
topology: tpu7x:2x2x1
jax: 0.10.0
libtpu: 0.0.40
codegen_flags: <defaults>
</compile_context>

<pallas_src>
import functools

import jax
import jax.numpy as jnp
from jax.experimental import pallas as pl
from jax.experimental.pallas import tpu as pltpu

_LANES = 128
# 8192 rows x 128 lanes x 4 B = 4 MiB per f32 tile. With double-buffered
# input + output that's ~16 MiB of VMEM; we raise the scoped limit explicitly
# so this is safe on v5e (16 MiB default), v6e (32 MiB default) and v7x
# (64 MiB physical).
_TILE_ROWS_32BIT = 8192
_VMEM_LIMIT_BYTES = 48 << 20


def _subtract_kernel(x_ref, o_ref, *, threshold):
    # threshold is a Python constant closed over at trace time (no SMEM operand).
    o_ref[...] = x_ref[...] - jnp.asarray(threshold, dtype=o_ref.dtype)


def subtract_layer(x: jax.Array, threshold: float) -> jax.Array:
    orig_shape = x.shape
    dtype = x.dtype
    total = x.size

    # Sublane packing: 8 rows/vreg for 32-bit, 16 for 16-bit, 32 for 8-bit.
    packing = max(1, 4 // jnp.dtype(dtype).itemsize)
    row_mult = 8 * packing
    tile_rows = _TILE_ROWS_32BIT * packing  # keep tile byte size constant per dtype

    if total % (_LANES * row_mult) == 0:
        # Common path: contiguous reshape is a free view, no padding copy.
        rows = total // _LANES
        x2d = x.reshape(rows, _LANES)
        padded = False
    else:
        # Genuinely ragged size: pad the flat vector up to full vregs.
        padded_total = pl.cdiv(total, _LANES * row_mult) * _LANES * row_mult
        flat = jnp.pad(x.reshape(-1), (0, padded_total - total))
        rows = padded_total // _LANES
        x2d = flat.reshape(rows, _LANES)
        padded = True

    kernel = functools.partial(_subtract_kernel, threshold=threshold)

    if rows <= tile_rows:
        # Single VMEM block, no grid: the whole op is a handful of vld/vsub/vst.
        out2d = pl.pallas_call(
            kernel,
            out_shape=jax.ShapeDtypeStruct((rows, _LANES), dtype),
            in_specs=[pl.BlockSpec(memory_space=pltpu.VMEM)],
            out_specs=pl.BlockSpec(memory_space=pltpu.VMEM),
        )(x2d)
    else:
        # Scaled-up path: 1-D parallel grid over lane-dense ~4 MiB row tiles.
        # cdiv grid lets Pallas handle the partial trailing block itself
        # (masked stores) -- no wrapper-side pad/slice of the whole array.
        out2d = pl.pallas_call(
            kernel,
            out_shape=jax.ShapeDtypeStruct((rows, _LANES), dtype),
            grid=(pl.cdiv(rows, tile_rows),),
            in_specs=[pl.BlockSpec((tile_rows, _LANES), lambda i: (i, 0))],
            out_specs=pl.BlockSpec((tile_rows, _LANES), lambda i: (i, 0)),
            compiler_params=pltpu.CompilerParams(
                dimension_semantics=("parallel",),
                vmem_limit_bytes=_VMEM_LIMIT_BYTES,
            ),
        )(x2d)

    if padded:
        return out2d.reshape(-1)[:total].reshape(orig_shape)
    return out2d.reshape(orig_shape)


if __name__ == "__main__":
    key = jax.random.PRNGKey(0)
    # Small NCHW-shaped input consistent with a conv-style tensor.
    x = jax.random.normal(key, (2, 4, 16, 16), dtype=jnp.float32)
    threshold = 0.5  # deterministic "parameter" from __init__

    out = subtract_layer(x, threshold)
    jax.block_until_ready(out)

    # Correctness check against plain JAX reference.
    ref = x - threshold
    assert out.shape == ref.shape and out.dtype == ref.dtype
    assert jnp.allclose(out, ref, atol=1e-6, rtol=1e-6)
    print("KERNEL_OK")
</pallas_src>

<mosaic_0001>
module attributes {stable_mosaic.version = 11 : i64} {
  func.func @_subtract_kernel(%arg0: memref<16x128xf32, #tpu.memory_space<vmem>>, %arg1: memref<16x128xf32, #tpu.memory_space<vmem>>) attributes {dimension_semantics = [], scalar_prefetch = 0 : i64, scratch_operands = 0 : i64, tpu.core_type = #tpu.core_type<tc>} {
    %c0 = arith.constant 0 : index
    %c0_0 = arith.constant 0 : index
    %0 = vector.load %arg0[%c0, %c0_0] : memref<16x128xf32, #tpu.memory_space<vmem>>, vector<16x128xf32>
    %cst = arith.constant 5.000000e-01 : f32
    %1 = vector.broadcast %cst : f32 to vector<16x128xf32>
    %2 = arith.subf %0, %1 : vector<16x128xf32>
    %c0_1 = arith.constant 0 : index
    %c0_2 = arith.constant 0 : index
    %3 = vector.load %arg1[%c0_1, %c0_2] : memref<16x128xf32, #tpu.memory_space<vmem>>, vector<16x128xf32>
    tpu.vector_store %arg1[%c0_1, %c0_2], %2 {strides = array<i32>} : memref<16x128xf32, #tpu.memory_space<vmem>>, vector<16x128xf32>,
    return
  }
}

</mosaic_0001>

<bundles_post_ra>
// kernel: tpu_custom_call.1
= control target key start
LH: loop header
LB: loop body
LE: loop exit
PB: predicated region body
PF: predicated region fallthrough
CT: control target
= control target key end

     0   :  { %6 = vsyncpa [#allocation3], 0  ;;  %s138_s0 = inlined_call_operand.hbm [shape: f32[16,128], index: 0, kind: input, shape index: {}]   ;;  %s139_s1 = inlined_call_operand.hbm [shape: f32[16,128], index: 1, kind: output, shape index: {}]  }
   0x1   :  { %7 = vsyncpa [#allocation4], 0  ;;  %s100_s6 = smov [#allocation2]   ;;  %s52_s10 = scalar_lea.hbm %s138_s0, 256 }
   0x2   :  { %s13_s7 = sshll.u32 %s100_s6, 4  ;;  %p53_p0 = scmp.ne.s32.totalorder %s138_s0, %s52_s10  ;;  %s14_s7 = int_to_ptr.vmem [resolvable:$true] %s13_s7 }
   0x3   :  { %p56_p1 = scmp.lt.u32.totalorder %s52_s10, %s138_s0 }
   0x5   :  { %p58_p2 = pnand %p56_p1, %p53_p0 }
   0x7   :  { %61 = shalt.err (!%p58_p2)
}
   0x8   :  { %s62_s15 = scalar_lea.vmem %s14_s7, 256  ;;  %p67_p4 = scmp.lt.s32.totalorder %s14_s7, %s14_s7 }
   0x9   :  { %p63_p3 = scmp.ne.s32.totalorder %s14_s7, %s62_s15  ;;  %p68_p5 = scmp.lt.s32.totalorder %s62_s15, %s62_s15 }
   0xb   :  { %p69_p6 = por %p68_p5, %p67_p4 }
   0xd   :  { %p70_p7 = pnand %p69_p6, %p63_p3 }
   0xf   :  { %73 = shalt.err (!%p70_p7)
}
  0x10   :  { %s101_s16 = smov 128   ;;  %s102_s17 = smov 8  }
  0x11   :  { %19 = dma.hbm_to_vmem [thread:$0]  %s138_s0, 256, %s14_s7, [#allocation3], %s101_s16, %s101_s16, %s102_s17  }
  0x12   :  { %96 = dma.done.wait [#allocation3], 256  }
  0x13   :  { %97 = vsyncadd [#allocation3], 4294967040  ;;  %s103_s20 = smov [#allocation5]   ;;  %v23_v0 = vld [vmem:[#allocation2] sm:$0xff]  ;;  %v24_v1 = vld [vmem:[#allocation2 + $0x8] sm:$0xff] }
  0x14   :  { %s34_s21 = sshll.u32 %s103_s20, 4  ;;  %v46_v2 = vadd.f32 -0.5, %v23_v0  ;;  %v47_v3 = vadd.f32 -0.5, %v24_v1  ;;  %s35_s21 = int_to_ptr.vmem [resolvable:$true] %s34_s21 }
  0x15   :  { %s74_s22 = scalar_lea.vmem %s35_s21, 256  ;;  %p79_p9 = scmp.lt.s32.totalorder %s35_s21, %s35_s21 }
  0x16   :  { %27 = vst [vmem:[#allocation5] sm:$0xff] %v46_v2  ;;  %28 = vst [vmem:[#allocation5 + $0x8] sm:$0xff] %v47_v3  ;;  %p75_p8 = scmp.ne.s32.totalorder %s35_s21, %s74_s22  ;;  %p80_p10 = scmp.lt.s32.totalorder %s74_s22, %s74_s22 }
  0x18   :  { %p81_p11 = por %p80_p10, %p79_p9 }
  0x1a   :  { %p82_p12 = pnand %p81_p11, %p75_p8 }
  0x1c   :  { %85 = shalt.err (!%p82_p12)
}
  0x1d   :  { %s86_s24 = scalar_lea.hbm %s139_s1, 256 }
  0x1e   :  { %p87_p13 = scmp.ne.s32.totalorder %s139_s1, %s86_s24  ;;  %p90_p0 = scmp.lt.u32.totalorder %s86_s24, %s139_s1 }
  0x20   :  { %p92_p1 = pnand %p90_p0, %p87_p13 }
  0x22   :  { %95 = shalt.err (!%p92_p1)
}
  0x23   :  { %40 = dma.vmem_to_hbm [thread:$0]  %s35_s21, 256, %s139_s1, [#allocation4], %s101_s16, %s101_s16, %s102_s17  }
  0x24   :  { %98 = dma.done.wait [#allocation4], 256  }
  0x25   :  { %99 = vsyncadd [#allocation4], 4294967040 }
  0x26   :  { %44 = vsyncpa [#allocation3], 1 }
  0x27   :  { %45 = vsyncpa [#allocation4], 1 }

</bundles_post_ra>
